<compile_context>
chip_gen: v7x
topology: tpu7x:2x2x1
jax: 0.10.0
libtpu: 0.0.40
codegen_flags: <defaults>
</compile_context>

<pallas_src>
import functools

import numpy as np
import jax
import jax.numpy as jnp
from jax.experimental import pallas as pl
from jax.experimental.pallas import tpu as pltpu

KH = KW = 5          # conv kernel size (both convs)
CONV_PAD = 1         # conv padding
POOL_K = 2           # maxpool kernel
POOL_S = 2           # maxpool stride (PyTorch default: stride = kernel_size)
POOL_PAD = 1         # maxpool padding


def _round_up(x, m):
    return (x + m - 1) // m * m


def _pool_groups(n):
    """Index groups for MaxPool(kernel=2, stride=2, padding=1), floor mode.

    Output position o covers padded indices {2o, 2o+1} == real {2o-1, 2o}
    clipped to [0, n).  Because POOL_PAD < POOL_K, every group is non-empty,
    so PyTorch's -inf padding never reaches an output element and a plain max
    over real positions is exact.
    """
    assert POOL_PAD < POOL_K, "pool padding must be < kernel for exactness"
    n_out = (n + 2 * POOL_PAD - POOL_K) // POOL_S + 1
    groups = [[i for i in (POOL_S * o - POOL_PAD, POOL_S * o - POOL_PAD + 1)
               if 0 <= i < n] for o in range(n_out)]
    assert all(groups), "empty pool window (would need -inf padding)"
    return groups


def _conv_as_matmul(w_oihw, in_h, in_w, pad=CONV_PAD):
    """Fold a bias-free conv (stride 1) into one dense matrix.

    w_oihw : (OC, IC, KH, KW) PyTorch conv weight.
    Returns (M, oh, ow) with M of shape (oh*ow*OC, in_h*in_w*IC) such that
        conv(x)[r, q, oc] == (M @ x_flat)[(r*ow + q)*OC + oc]
    where x_flat has row index (h*in_w + w)*IC + k (channels-last flatten).
    Zero padding is handled by simply dropping out-of-range taps.
    """
    w = np.asarray(w_oihw, np.float32)
    oc, ic, kh, kw = w.shape
    oh = in_h + 2 * pad - kh + 1
    ow = in_w + 2 * pad - kw + 1
    assert oh >= 1 and ow >= 1, "input spatial size too small for the conv"
    m = np.zeros((oh * ow * oc, in_h * in_w * ic), np.float32)
    for r in range(oh):
        for q in range(ow):
            row0 = (r * ow + q) * oc
            for i in range(kh):
                hh = r + i - pad
                if not 0 <= hh < in_h:
                    continue
                for j in range(kw):
                    ww = q + j - pad
                    if not 0 <= ww < in_w:
                        continue
                    col0 = (hh * in_w + ww) * ic
                    m[row0:row0 + oc, col0:col0 + ic] = w[:, :, i, j]
    return m, oh, ow


def _cnn3_kernel(x_ref, w1_ref, w2_ref, wf1_ref, wf2_ref, o_ref, *,
                 oh1, ow1, oc1):
    """Fused CNN3 forward for one batch tile.  Batch is the lane axis."""
    # conv1 + ReLU: one dense matmul over the whole flattened image.
    # (oh1*ow1*oc1, H*W*C) x (H*W*C, B_TILE) -> (oh1*ow1*oc1, B_TILE), f32 acc.
    a1 = jnp.dot(w1_ref[...], x_ref[...], preferred_element_type=jnp.float32)
    a1 = jnp.maximum(a1, 0.0)                                   # ReLU in f32

    # maxpool1 (2x2, stride 2, pad 1): max over 8-sublane-aligned channel
    # blocks of a1; each block is a static, tile-aligned sublane slice.
    rgs, cgs = _pool_groups(oh1), _pool_groups(ow1)

    def cblk(r, q):
        s = (r * ow1 + q) * oc1
        return a1[s:s + oc1, :]

    pieces = []
    for rg in rgs:
        for cg in cgs:
            cells = [(r, q) for r in rg for q in cg]
            m = cblk(*cells[0])
            for rq in cells[1:]:
                m = jnp.maximum(m, cblk(*rq))
            pieces.append(m)
    # (ph1*pw1*oc1, B_TILE); cast to bf16 exactly once for the next matmul.
    p1 = jnp.concatenate(pieces, axis=0).astype(jnp.bfloat16)

    # conv2 + ReLU: output spatial is 1x1 -> a single matmul.
    # maxpool2 on a 1x1 map is the identity (window contains only the real
    # element), so it is skipped.
    a2 = jnp.maximum(
        jnp.dot(w2_ref[...], p1, preferred_element_type=jnp.float32), 0.0)

    # fc1 + ReLU, fc2 — batched over the whole tile.
    hid = jnp.maximum(
        jnp.dot(wf1_ref[...], a2.astype(jnp.bfloat16),
                preferred_element_type=jnp.float32), 0.0)
    logits = jnp.dot(wf2_ref[...], hid.astype(jnp.bfloat16),
                     preferred_element_type=jnp.float32)
    o_ref[...] = logits.astype(o_ref.dtype)        # (num_classes, B_TILE)


def cnn3_forward(x_nchw, params):
    """CNN3 forward.  x_nchw: (B, C_in, H, W) f32 (PyTorch layout)."""
    b, c_in, h, w = x_nchw.shape
    w1, w2 = params["w1_mat"], params["w2_mat"]
    wf1, wf2 = params["w_fc1"], params["w_fc2"]

    # Static shape bookkeeping (6 -> 4 -> 3 -> 1 -> 1 for the 6x6 input).
    oh1 = h + 2 * CONV_PAD - KH + 1
    ow1 = w + 2 * CONV_PAD - KW + 1
    ph1, pw1 = len(_pool_groups(oh1)), len(_pool_groups(ow1))
    oh2 = ph1 + 2 * CONV_PAD - KH + 1
    ow2 = pw1 + 2 * CONV_PAD - KW + 1
    assert oh2 == 1 and ow2 == 1, (
        "CNN3's fc1 only type-checks when the spatial size collapses to 1x1")
    assert len(_pool_groups(oh2)) == 1 and len(_pool_groups(ow2)) == 1
    assert w1.shape[1] == h * w * c_in
    oc1 = w1.shape[0] // (oh1 * ow1)
    assert w1.shape[0] == oh1 * ow1 * oc1
    oc2 = w2.shape[0]
    assert w2.shape[1] == ph1 * pw1 * oc1
    num_hiddens = wf1.shape[0]
    num_classes = wf2.shape[0]
    assert wf1.shape[1] == oc2 and wf2.shape[1] == num_hiddens

    # Batch goes on the lane axis: (B, C, H, W) -> (H, W, C, B) -> (H*W*C, B).
    # Row index (hh*w + ww)*c_in + k matches the columns of w1_mat.
    x_prep = jnp.transpose(x_nchw, (2, 3, 1, 0)).reshape(h * w * c_in, b)
    x_prep = x_prep.astype(jnp.bfloat16)           # bf16 MXU operand, once

    # Batch-tile sizing: amortize per-grid-step overhead; keep the grid
    # length >= 2 for large batches so ("parallel",) uses both v7x TCs.
    if b >= 512:
        b_tile = 256
    elif b >= 128:
        b_tile = 128
    else:
        b_tile = _round_up(b, 8)
    b_pad = _round_up(b, b_tile)
    if b_pad != b:
        x_prep = jnp.pad(x_prep, ((0, 0), (0, b_pad - b)))
    n_tiles = b_pad // b_tile

    per_col_flops = 2 * (w1.shape[0] * w1.shape[1] + w2.shape[0] * w2.shape[1]
                         + wf1.shape[0] * wf1.shape[1]
                         + wf2.shape[0] * wf2.shape[1])
    cost = pl.CostEstimate(
        flops=per_col_flops * b_pad,
        transcendentals=0,
        bytes_accessed=(x_prep.size * 2 + num_classes * b_pad * 4
                        + 2 * (w1.size + w2.size + wf1.size + wf2.size)))

    out = pl.pallas_call(
        functools.partial(_cnn3_kernel, oh1=oh1, ow1=ow1, oc1=oc1),
        out_shape=jax.ShapeDtypeStruct((num_classes, b_pad), jnp.float32),
        grid_spec=pltpu.PrefetchScalarGridSpec(
            num_scalar_prefetch=0,
            grid=(n_tiles,),                       # one program per batch tile
            in_specs=[
                # Activations: one lane-dense batch slab per grid step.
                pl.BlockSpec((h * w * c_in, b_tile), lambda i: (0, i)),
                # Weights: full-array blocks with constant index_map, so they
                # are DMA'd once and stay VMEM-resident across grid steps.
                pl.BlockSpec(w1.shape, lambda i: (0, 0)),
                pl.BlockSpec(w2.shape, lambda i: (0, 0)),
                pl.BlockSpec(wf1.shape, lambda i: (0, 0)),
                pl.BlockSpec(wf2.shape, lambda i: (0, 0)),
            ],
            out_specs=pl.BlockSpec((num_classes, b_tile), lambda i: (0, i)),
        ),
        compiler_params=pltpu.CompilerParams(
            # Batch tiles are independent -> shard across the two TensorCores
            # on v7x (no-op on single-TC v5e/v6e).
            dimension_semantics=("parallel",),
        ),
        cost_estimate=cost,
    )(x_prep, w1, w2, wf1, wf2)

    return out[:, :b].T                            # (B, num_classes)


def init_params(key, in_channels, hidden_channels, num_hiddens, num_classes,
                h=6, w=6):
    """Random params in PyTorch layouts, pre-transformed once for the kernel.

    Both convs (including their zero padding and every output position) are
    folded into dense matrices at init; everything is stored bf16 so every
    in-kernel matmul takes the bf16 MXU path with f32 accumulation.
    """
    k1, k2, k3, k4 = jax.random.split(key, 4)
    # PyTorch layouts: conv (out_ch, in_ch, KH, KW); linear (out, in); no biases.
    w_conv1 = 0.1 * jax.random.normal(
        k1, (hidden_channels, in_channels, KH, KW), jnp.float32)
    w_conv2 = 0.1 * jax.random.normal(
        k2, (hidden_channels * 2, hidden_channels, KH, KW), jnp.float32)
    w_fc1 = 0.1 * jax.random.normal(
        k3, (num_hiddens, hidden_channels * 2), jnp.float32)
    w_fc2 = 0.1 * jax.random.normal(
        k4, (num_classes, num_hiddens), jnp.float32)

    m1, oh1, ow1 = _conv_as_matmul(np.asarray(w_conv1), h, w)
    ph1, pw1 = len(_pool_groups(oh1)), len(_pool_groups(ow1))
    m2, oh2, ow2 = _conv_as_matmul(np.asarray(w_conv2), ph1, pw1)
    assert oh2 == 1 and ow2 == 1, "expected 6x6 input for CNN3"

    return {
        "w1_mat": jnp.asarray(m1, jnp.bfloat16),    # (OH1*OW1*OC1, H*W*C_in)
        "w2_mat": jnp.asarray(m2, jnp.bfloat16),    # (OC2, PH1*PW1*OC1)
        "w_fc1": jnp.asarray(w_fc1, jnp.bfloat16),  # (num_hiddens, OC2)
        "w_fc2": jnp.asarray(w_fc2, jnp.bfloat16),  # (num_classes, num_hiddens)
    }


if __name__ == "__main__":
    # Spatial size 6 is forced by the module: 6 -conv-> 4 -pool-> 3 -conv-> 1
    # -pool-> 1, so flatten() yields exactly hidden*2 features for fc1.
    B, IN_C, H, W = 2, 4, 6, 6
    HIDDEN, NUM_HIDDENS, NUM_CLASSES = 8, 32, 10

    root = jax.random.PRNGKey(0)
    kx, kp = jax.random.split(root)
    x = jax.random.normal(kx, (B, IN_C, H, W), jnp.float32)   # NCHW input
    params = init_params(kp, IN_C, HIDDEN, NUM_HIDDENS, NUM_CLASSES, H, W)

    out = jax.jit(cnn3_forward)(x, params)
    out = jax.block_until_ready(out)
    assert out.shape == (B, NUM_CLASSES), out.shape
    assert out.dtype == jnp.float32
    print("KERNEL_OK")
</pallas_src>

<mosaic_0001>
module attributes {stable_mosaic.version = 11 : i64} {
  func.func @_cnn3_kernel(%arg0: i32, %arg1: memref<144x8xbf16, #tpu.memory_space<vmem>>, %arg2: memref<128x144xbf16, #tpu.memory_space<vmem>>, %arg3: memref<16x72xbf16, #tpu.memory_space<vmem>>, %arg4: memref<32x16xbf16, #tpu.memory_space<vmem>>, %arg5: memref<10x32xbf16, #tpu.memory_space<vmem>>, %arg6: memref<10x8xf32, #tpu.memory_space<vmem>>) attributes {dimension_semantics = [#tpu.dimension_semantics<parallel>], iteration_bounds = array<i64: 1>, scalar_prefetch = 0 : i64, scratch_operands = 0 : i64, tpu.core_type = #tpu.core_type<tc>, window_params = [{transform_indices = @transform_0, window_bounds = array<i64: 144, 8>}, {pipeline_mode = #tpu.pipeline_mode<synchronous>, transform_indices = @transform_1, window_bounds = array<i64: 128, 144>}, {pipeline_mode = #tpu.pipeline_mode<synchronous>, transform_indices = @transform_2, window_bounds = array<i64: 16, 72>}, {pipeline_mode = #tpu.pipeline_mode<synchronous>, transform_indices = @transform_3, window_bounds = array<i64: 32, 16>}, {pipeline_mode = #tpu.pipeline_mode<synchronous>, transform_indices = @transform_4, window_bounds = array<i64: 10, 32>}, {transform_indices = @transform_5, window_bounds = array<i64: 10, 8>}]} {
    %c0 = arith.constant 0 : index
    %c0_0 = arith.constant 0 : index
    %0 = vector.load %arg2[%c0, %c0_0] : memref<128x144xbf16, #tpu.memory_space<vmem>>, vector<128x144xbf16>
    %c0_1 = arith.constant 0 : index
    %c0_2 = arith.constant 0 : index
    %1 = vector.load %arg1[%c0_1, %c0_2] : memref<144x8xbf16, #tpu.memory_space<vmem>>, vector<144x8xbf16>
    %cst = arith.constant dense<0.000000e+00> : vector<128x8xf32>
    %2 = tpu.matmul %0, %1, %cst {dimension_numbers = #tpu.dot_dimension_numbers<[1], [0], [0], [1], [0, 0, 1, 1], [], []>} : vector<128x144xbf16>, vector<144x8xbf16>, vector<128x8xf32> -> vector<128x8xf32>
    %cst_3 = arith.constant 0.000000e+00 : f32
    %3 = vector.broadcast %cst_3 : f32 to vector<128x8xf32>
    %4 = arith.maximumf %2, %3 : vector<128x8xf32>
    %5 = vector.extract_strided_slice %4 {offsets = [0, 0], sizes = [8, 8], strides = [1, 1]} : vector<128x8xf32> to vector<8x8xf32>
    %6 = vector.extract_strided_slice %4 {offsets = [8, 0], sizes = [8, 8], strides = [1, 1]} : vector<128x8xf32> to vector<8x8xf32>
    %7 = vector.extract_strided_slice %4 {offsets = [16, 0], sizes = [8, 8], strides = [1, 1]} : vector<128x8xf32> to vector<8x8xf32>
    %8 = arith.maximumf %6, %7 : vector<8x8xf32>
    %9 = vector.extract_strided_slice %4 {offsets = [24, 0], sizes = [8, 8], strides = [1, 1]} : vector<128x8xf32> to vector<8x8xf32>
    %10 = vector.extract_strided_slice %4 {offsets = [32, 0], sizes = [8, 8], strides = [1, 1]} : vector<128x8xf32> to vector<8x8xf32>
    %11 = vector.extract_strided_slice %4 {offsets = [64, 0], sizes = [8, 8], strides = [1, 1]} : vector<128x8xf32> to vector<8x8xf32>
    %12 = arith.maximumf %10, %11 : vector<8x8xf32>
    %13 = vector.extract_strided_slice %4 {offsets = [40, 0], sizes = [8, 8], strides = [1, 1]} : vector<128x8xf32> to vector<8x8xf32>
    %14 = vector.extract_strided_slice %4 {offsets = [48, 0], sizes = [8, 8], strides = [1, 1]} : vector<128x8xf32> to vector<8x8xf32>
    %15 = arith.maximumf %13, %14 : vector<8x8xf32>
    %16 = vector.extract_strided_slice %4 {offsets = [72, 0], sizes = [8, 8], strides = [1, 1]} : vector<128x8xf32> to vector<8x8xf32>
    %17 = arith.maximumf %15, %16 : vector<8x8xf32>
    %18 = vector.extract_strided_slice %4 {offsets = [80, 0], sizes = [8, 8], strides = [1, 1]} : vector<128x8xf32> to vector<8x8xf32>
    %19 = arith.maximumf %17, %18 : vector<8x8xf32>
    %20 = vector.extract_strided_slice %4 {offsets = [56, 0], sizes = [8, 8], strides = [1, 1]} : vector<128x8xf32> to vector<8x8xf32>
    %21 = vector.extract_strided_slice %4 {offsets = [88, 0], sizes = [8, 8], strides = [1, 1]} : vector<128x8xf32> to vector<8x8xf32>
    %22 = arith.maximumf %20, %21 : vector<8x8xf32>
    %23 = vector.extract_strided_slice %4 {offsets = [96, 0], sizes = [8, 8], strides = [1, 1]} : vector<128x8xf32> to vector<8x8xf32>
    %24 = vector.extract_strided_slice %4 {offsets = [104, 0], sizes = [8, 8], strides = [1, 1]} : vector<128x8xf32> to vector<8x8xf32>
    %25 = vector.extract_strided_slice %4 {offsets = [112, 0], sizes = [8, 8], strides = [1, 1]} : vector<128x8xf32> to vector<8x8xf32>
    %26 = arith.maximumf %24, %25 : vector<8x8xf32>
    %27 = vector.extract_strided_slice %4 {offsets = [120, 0], sizes = [8, 8], strides = [1, 1]} : vector<128x8xf32> to vector<8x8xf32>
    %28 = tpu.concatenate %5, %8, %9, %12, %19, %22, %23, %26, %27 in 0 : vector<8x8xf32>, vector<8x8xf32>, vector<8x8xf32>, vector<8x8xf32>, vector<8x8xf32>, vector<8x8xf32>, vector<8x8xf32>, vector<8x8xf32>, vector<8x8xf32> -> vector<72x8xf32>
    %29 = arith.truncf %28 : vector<72x8xf32> to vector<72x8xbf16>
    %c0_4 = arith.constant 0 : index
    %c0_5 = arith.constant 0 : index
    %30 = vector.load %arg3[%c0_4, %c0_5] : memref<16x72xbf16, #tpu.memory_space<vmem>>, vector<16x72xbf16>
    %cst_6 = arith.constant dense<0.000000e+00> : vector<16x8xf32>
    %31 = tpu.matmul %30, %29, %cst_6 {dimension_numbers = #tpu.dot_dimension_numbers<[1], [0], [0], [1], [0, 0, 1, 1], [], []>} : vector<16x72xbf16>, vector<72x8xbf16>, vector<16x8xf32> -> vector<16x8xf32>
    %cst_7 = arith.constant 0.000000e+00 : f32
    %32 = vector.broadcast %cst_7 : f32 to vector<16x8xf32>
    %33 = arith.maximumf %31, %32 : vector<16x8xf32>
    %c0_8 = arith.constant 0 : index
    %c0_9 = arith.constant 0 : index
    %34 = vector.load %arg4[%c0_8, %c0_9] : memref<32x16xbf16, #tpu.memory_space<vmem>>, vector<32x16xbf16>
    %35 = arith.truncf %33 : vector<16x8xf32> to vector<16x8xbf16>
    %cst_10 = arith.constant dense<0.000000e+00> : vector<32x8xf32>
    %36 = tpu.matmul %34, %35, %cst_10 {dimension_numbers = #tpu.dot_dimension_numbers<[1], [0], [0], [1], [0, 0, 1, 1], [], []>} : vector<32x16xbf16>, vector<16x8xbf16>, vector<32x8xf32> -> vector<32x8xf32>
    %cst_11 = arith.constant 0.000000e+00 : f32
    %37 = vector.broadcast %cst_11 : f32 to vector<32x8xf32>
    %38 = arith.maximumf %36, %37 : vector<32x8xf32>
    %c0_12 = arith.constant 0 : index
    %c0_13 = arith.constant 0 : index
    %39 = vector.load %arg5[%c0_12, %c0_13] : memref<10x32xbf16, #tpu.memory_space<vmem>>, vector<10x32xbf16>
    %40 = arith.truncf %38 : vector<32x8xf32> to vector<32x8xbf16>
    %cst_14 = arith.constant dense<0.000000e+00> : vector<10x8xf32>
    %41 = tpu.matmul %39, %40, %cst_14 {dimension_numbers = #tpu.dot_dimension_numbers<[1], [0], [0], [1], [0, 0, 1, 1], [], []>} : vector<10x32xbf16>, vector<32x8xbf16>, vector<10x8xf32> -> vector<10x8xf32>
    %c0_15 = arith.constant 0 : index
    %c0_16 = arith.constant 0 : index
    %42 = vector.load %arg6[%c0_15, %c0_16] : memref<10x8xf32, #tpu.memory_space<vmem>>, vector<10x8xf32>
    tpu.vector_store %arg6[%c0_15, %c0_16], %41 {strides = array<i32>} : memref<10x8xf32, #tpu.memory_space<vmem>>, vector<10x8xf32>,
    return
  }
  func.func @transform_0(%arg0: i32) -> (i32, i32) {
    %c0_i32 = arith.constant 0 : i32
    %c0_i32_0 = arith.constant 0 : i32
    return %c0_i32, %arg0 : i32, i32
  }
  func.func @transform_1(%arg0: i32) -> (i32, i32) {
    %c0_i32 = arith.constant 0 : i32
    %c0_i32_0 = arith.constant 0 : i32
    %c0_i32_1 = arith.constant 0 : i32
    return %c0_i32, %c0_i32_0 : i32, i32
  }
  func.func @transform_2(%arg0: i32) -> (i32, i32) {
    %c0_i32 = arith.constant 0 : i32
    %c0_i32_0 = arith.constant 0 : i32
    %c0_i32_1 = arith.constant 0 : i32
    return %c0_i32, %c0_i32_0 : i32, i32
  }
  func.func @transform_3(%arg0: i32) -> (i32, i32) {
    %c0_i32 = arith.constant 0 : i32
    %c0_i32_0 = arith.constant 0 : i32
    %c0_i32_1 = arith.constant 0 : i32
    return %c0_i32, %c0_i32_0 : i32, i32
  }
  func.func @transform_4(%arg0: i32) -> (i32, i32) {
    %c0_i32 = arith.constant 0 : i32
    %c0_i32_0 = arith.constant 0 : i32
    %c0_i32_1 = arith.constant 0 : i32
    return %c0_i32, %c0_i32_0 : i32, i32
  }
  func.func @transform_5(%arg0: i32) -> (i32, i32) {
    %c0_i32 = arith.constant 0 : i32
    %c0_i32_0 = arith.constant 0 : i32
    return %c0_i32, %arg0 : i32, i32
  }
}

</mosaic_0001>

<bundles_post_ra>
// kernel: cnn3_forward.1
= control target key start
LH: loop header
LB: loop body
LE: loop exit
PB: predicated region body
PF: predicated region fallthrough
CT: control target
= control target key end

     0   :  { %v664_v0 = vmov 0   ;;  %vm181_vm0 = vcmask 130048   ;;  %v665_v26 = vmov 0.0   ;;  %vm666_vm1 = vmmov 0   ;;  %s811_s0 = inlined_call_operand.vmem [shape: bf16[144,8], index: 0, kind: input, shape index: {}]   ;;  %s812_s1 = inlined_call_operand.vmem [shape: bf16[128,144], index: 1, kind: input, shape index: {}]   ;;  %s813_s2 = inlined_call_operand.vmem [shape: bf16[16,72], index: 2, kind: input, shape index: {}]   ;;  %s814_s3 = inlined_call_operand.vmem [shape: bf16[32,16], index: 3, kind: input, shape index: {}]   ;;  %s815_s4 = inlined_call_operand.vmem [shape: bf16[10,32], index: 4, kind: input, shape index: {}]   ;;  %s816_s5 = inlined_call_operand.vmem [shape: f32[10,8], index: 5, kind: output, shape index: {}]  }
   0x1   :  { %206 = vmatprep.subr.bf16.mxu0 %v664_v0  ;;  %v627_v1 = vld [vmem:[%s811_s0] sm:$0xff]   ;;  %606 = vmatprep.subr.bf16.mxu1 %v664_v0  ;;  %v628_v2 = vld [vmem:[%s811_s0 + $0x8] sm:$0xff]   ;;  %v629_v3 = vld [vmem:[%s811_s0 + $0x10] sm:$0xff]   ;;  %vm342_vm2 = vcmask 1043456   ;;  %vm338_vm3 = vcmask 588800   ;;  %vm472_vm4 = vcmask 261120  }
   0x2   :  { %207 = vmatpush1.bf16.msra.mxu0 %v627_v1  ;;  %615 = vmatpush1.bf16.msra.mxu1 %v627_v1  ;;  %v630_v4 = vld [vmem:[%s811_s0 + $0x18] sm:$0xff]   ;;  %v638_v5 = vld [vmem:[%s812_s1 + $0x4] ss:$8 sps:$4 sm:$0xff]   ;;  %v633_v9 = vld [vmem:[%s811_s0 + $0x30] sm:$0xff]   ;;  %vm517_vm5 = vcmask 64512   ;;  %vm519_vm6 = vcmask 58368  }
   0x3   :  { %208 = vmatprep.subr.bf16.mxu0 %v664_v0  ;;  %607 = vmatprep.subr.bf16.mxu1 %v664_v0  ;;  %v631_v6 = vld [vmem:[%s811_s0 + $0x20] sm:$0xff]   ;;  %v632_v8 = vld [vmem:[%s811_s0 + $0x28] sm:$0xff]   ;;  %v634_v10 = vld [vmem:[%s811_s0 + $0x38] sm:$0xff]  }
   0x4   :  { %550 = vmatprep.mubr.msk.bf16.mxu0 %vm181_vm0, %v638_v5  ;;  %v650_v7 = vld [vmem:[%s812_s1 + $0x64] ss:$8 sps:$4 sm:$0xff]   ;;  %v636_v12 = vld [vmem:[%s812_s1] ss:$8 sps:$4 sm:$0xff]   ;;  %v639_v14 = vld [vmem:[%s812_s1 + $0x14] ss:$8 sps:$4 sm:$0xff]  }
   0x5   :  { %556 = vmatprep.mubr.msk.bf16.mxu1 %vm181_vm0, %v650_v7  ;;  %v635_v11 = vld [vmem:[%s811_s0 + $0x40] sm:$0xff]   ;;  %v654_v15 = vld [vmem:[%s812_s1 + $0x74] ss:$8 sps:$4 sm:$0xff]   ;;  %v641_v16 = vld [vmem:[%s812_s1 + $0x10] ss:$8 sps:$4 sm:$0xff]  }
   0x6   :  { %209 = vmatpush1.bf16.msra.mxu0 %v628_v2  ;;  %616 = vmatpush1.bf16.msra.mxu1 %v628_v2  ;;  %v648_v13 = vld [vmem:[%s812_s1 + $0x60] ss:$8 sps:$4 sm:$0xff]   ;;  %v656_v17 = vld [vmem:[%s812_s1 + $0x70] ss:$8 sps:$4 sm:$0xff]   ;;  %v642_v18 = vld [vmem:[%s812_s1 + $0x24] ss:$8 sps:$4 sm:$0xff]  }
   0x7   :  { %210 = vmatprep.subr.bf16.mxu0 %v664_v0  ;;  %608 = vmatprep.subr.bf16.mxu1 %v664_v0  ;;  %v644_v19 = vld [vmem:[%s812_s1 + $0x20] ss:$8 sps:$4 sm:$0xff]   ;;  %v645_v20 = vld [vmem:[%s812_s1 + $0x34] ss:$8 sps:$4 sm:$0xff]   ;;  %v647_v21 = vld [vmem:[%s812_s1 + $0x30] ss:$8 sps:$4 sm:$0xff]  }
   0x8   :  { %v651_v22 = vld [vmem:[%s812_s1 + $0x44] ss:$8 sps:$4 sm:$0xff]   ;;  %v653_v23 = vld [vmem:[%s812_s1 + $0x40] ss:$8 sps:$4 sm:$0xff]   ;;  %v657_v24 = vld [vmem:[%s812_s1 + $0x54] ss:$8 sps:$4 sm:$0xff]  }
   0x9   :  { %v659_v25 = vld [vmem:[%s812_s1 + $0x50] ss:$8 sps:$4 sm:$0xff]  }
   0xa   :  { %211 = vmatpush1.bf16.msra.mxu0 %v629_v3  ;;  %617 = vmatpush1.bf16.msra.mxu1 %v629_v3 }
   0xb   :  { %212 = vmatprep.subr.bf16.mxu0 %v664_v0  ;;  %609 = vmatprep.subr.bf16.mxu1 %v664_v0 }
   0xe   :  { %213 = vmatpush1.bf16.msra.mxu0 %v630_v4  ;;  %618 = vmatpush1.bf16.msra.mxu1 %v630_v4 }
   0xf   :  { %214 = vmatprep.subr.bf16.mxu0 %v664_v0  ;;  %610 = vmatprep.subr.bf16.mxu1 %v664_v0 }
  0x12   :  { %215 = vmatpush1.bf16.msra.mxu0 %v631_v6  ;;  %619 = vmatpush1.bf16.msra.mxu1 %v631_v6 }
  0x13   :  { %216 = vmatprep.subr.bf16.mxu0 %v664_v0  ;;  %611 = vmatprep.subr.bf16.mxu1 %v664_v0 }
  0x16   :  { %217 = vmatpush1.bf16.msra.mxu0 %v632_v8  ;;  %620 = vmatpush1.bf16.msra.mxu1 %v632_v8 }
  0x17   :  { %218 = vmatprep.subr.bf16.mxu0 %v664_v0  ;;  %612 = vmatprep.subr.bf16.mxu1 %v664_v0 }
  0x1a   :  { %219 = vmatpush1.bf16.msra.mxu0 %v633_v9  ;;  %621 = vmatpush1.bf16.msra.mxu1 %v633_v9 }
  0x1b   :  { %220 = vmatprep.subr.bf16.mxu0 %v664_v0  ;;  %613 = vmatprep.subr.bf16.mxu1 %v664_v0 }
  0x1e   :  { %221 = vmatpush1.bf16.msra.mxu0 %v634_v10  ;;  %622 = vmatpush1.bf16.msra.mxu1 %v634_v10 }
  0x1f   :  { %222 = vmatprep.subr.bf16.mxu0 %v664_v0  ;;  %614 = vmatprep.subr.bf16.mxu1 %v664_v0 }
  0x22   :  { %223 = vmatpush1.bf16.msra.mxu0 %v635_v11  ;;  %623 = vmatpush1.bf16.msra.mxu1 %v635_v11 }
  0x23   :  { %578 = vmatprep.subr.bf16.mxu1 %v665_v26 }
  0x25   :  { %239 = vmatmul.mubr.bf16.vlgmr.msra.gmra.mrb[0].mxu0 %v636_v12  ;;  %287 = vmatmul.mubr.bf16.vlgmr.msra.gmra.mrb[0].mxu1 %v648_v13 }
  0x26   :  { %551 = vmatprep.mubr.msk.bf16.mxu0 %vm181_vm0, %v639_v14  ;;  %557 = vmatprep.mubr.msk.bf16.mxu1 %vm181_vm0, %v654_v15 }
  0x2d   :  { %247 = vmatmul.mubr.bf16.gmra.mrb[4].mxu0 %v641_v16  ;;  %295 = vmatmul.mubr.bf16.gmra.mrb[4].mxu1 %v656_v17 }
  0x2e   :  { %552 = vmatprep.mubr.msk.bf16.mxu0 %vm181_vm0, %v642_v18  ;;  %588 = vmatprep.mubr.msk.bf16.mxu1 %vm666_vm1, %v665_v26 }
  0x35   :  { %255 = vmatmul.mubr.bf16.gmra.mrb[8].mxu0 %v644_v19 }
  0x36   :  { %553 = vmatprep.mubr.msk.bf16.mxu0 %vm181_vm0, %v645_v20 }
  0x3d   :  { %263 = vmatmul.mubr.bf16.gmra.mrb[12].mxu0 %v647_v21 }
  0x3e   :  { %554 = vmatprep.mubr.msk.bf16.mxu0 %vm181_vm0, %v651_v22 }
  0x45   :  { %271 = vmatmul.mubr.bf16.gmra.mrb[16].mxu0 %v653_v23 }
  0x46   :  { %555 = vmatprep.mubr.msk.bf16.mxu0 %vm181_vm0, %v657_v24  ;;  %v660_v24 = vld [vmem:[%s813_s2] sm:$0xff]  }
  0x4d   :  { %279 = vmatmul.mubr.bf16.gmra.mrb[20].mxu0 %v659_v25  ;;  %v661_v25 = vld [vmem:[%s814_s3] sm:$0xff]  }
  0xf8   :  { %v240_v27 = vpop.f32.mrb[0].mxu0  ;;  %v288_v28 = vpop.f32.mrb[0].mxu1 }
  0xf9   :  { %v242_v29 = vpop.f32.mrb[1].mxu0  ;;  %v290_v30 = vpop.f32.mrb[1].mxu1  ;;  %v315_v41 = vmax.f32 %v288_v28, 0.0  ;;  %v303_v46 = vmax.f32 %v240_v27, 0.0 }
  0xfa   :  { %v243_v31 = vpop.f32.mrb[2].mxu0  ;;  %v291_v32 = vpop.f32.mrb[2].mxu1 }
  0xfb   :  { %v245_v33 = vpop.f32.mrb[3].mxu0  ;;  %v293_v34 = vpop.f32.mrb[3].mxu1  ;;  %v316_v35 = vmax.f32 %v291_v32, 0.0  ;;  %v304_v38 = vmax.f32 %v243_v31, 0.0 }
  0xfc   :  { %v662_v34 = vld [vmem:[%s814_s3 + $0x8] sm:$0xff]  }
 0x100   :  { %v248_v36 = vpop.f32.mrb[4].mxu0  ;;  %v296_v37 = vpop.f32.mrb[4].mxu1 }
 0x101   :  { %v305_v39 = vmax.f32 %v248_v36, 0.0  ;;  %v250_v40 = vpop.f32.mrb[5].mxu0  ;;  %v317_v42 = vmax.f32 %v296_v37, 0.0  ;;  %v298_v43 = vpop.f32.mrb[5].mxu1 }
 0x102   :  { %v251_v44 = vpop.f32.mrb[6].mxu0  ;;  %v299_v45 = vpop.f32.mrb[6].mxu1 }
 0x103   :  { %v319_v47 = vmax.f32 %v304_v38, %v305_v39  ;;  %v253_v48 = vpop.f32.mrb[7].mxu0  ;;  %v325_v49 = vmax.f32 %v316_v35, %v317_v42  ;;  %v301_v50 = vpop.f32.mrb[7].mxu1  ;;  %v306_v5 = vmax.f32 %v251_v44, 0.0  ;;  %v318_v21 = vmax.f32 %v299_v45, 0.0  ;;  %v663_v45 = vld [vmem:[%s815_s4] sm:$0x1f]  }
 0x105   :  { %v326_v51 = vpack.c.bf16 %v319_v47, %v303_v46  ;;  %v329_v52 = vpack.c.bf16 %v325_v49, %v315_v41  ;;  %v330_v22 = vpack.c.bf16 %v318_v21, %v318_v21 }
 0x107   :  { %579 = vmatpush3.bf16.msra.mxu1 %v326_v51  ;;  %v344_v23 = vsel %vm342_vm2, %v330_v22, 0 }
 0x108   :  { %v256_v53 = vpop.f32.mrb[8].mxu0  ;;  %580 = vmatprep.subr.bf16.mxu1 %v665_v26 }
 0x109   :  { %v258_v54 = vpop.f32.mrb[9].mxu0  ;;  %v307_v1 = vmax.f32 %v256_v53, 0.0 }
 0x10a   :  { %v259_v55 = vpop.f32.mrb[10].mxu0 }
 0x10b   :  { %v261_v56 = vpop.f32.mrb[11].mxu0  ;;  %v308_v58 = vmax.f32 %v259_v55, 0.0 }
 0x110   :  { %v264_v57 = vpop.f32.mrb[12].mxu0 }
 0x111   :  { %v309_v59 = vmax.f32 %v264_v57, 0.0  ;;  %v266_v60 = vpop.f32.mrb[13].mxu0 }
 0x112   :  { %v267_v61 = vpop.f32.mrb[14].mxu0 }
 0x113   :  { %v321_v62 = vmax.f32 %v308_v58, %v309_v59  ;;  %v269_v63 = vpop.f32.mrb[15].mxu0  ;;  %v310_v15 = vmax.f32 %v267_v61, 0.0 }
 0x118   :  { %v272_v0 = vpop.f32.mrb[16].mxu0 }
 0x119   :  { %v311_v2 = vmax.f32 %v272_v0, 0.0  ;;  %v274_v3 = vpop.f32.mrb[17].mxu0 }
 0x11a   :  { %v275_v4 = vpop.f32.mrb[18].mxu0 }
 0x11b   :  { %v320_v6 = vmax.f32 %v307_v1, %v311_v2  ;;  %v312_v7 = vmax.f32 %v275_v4, 0.0  ;;  %v277_v8 = vpop.f32.mrb[19].mxu0 }
 0x11d   :  { %v327_v9 = vpack.c.bf16 %v320_v6, %v306_v5  ;;  %v322_v10 = vmax.f32 %v321_v62, %v312_v7 }
 0x11f   :  { %581 = vmatpush3.bf16.msra.mxu1 %v327_v9 }
 0x120   :  { %v280_v11 = vpop.f32.mrb[20].mxu0  ;;  %582 = vmatprep.subr.bf16.mxu1 %v665_v26 }
 0x121   :  { %v313_v12 = vmax.f32 %v280_v11, 0.0  ;;  %v282_v13 = vpop.f32.mrb[21].mxu0 }
 0x122   :  { %v283_v14 = vpop.f32.mrb[22].mxu0 }
 0x123   :  { %v323_v16 = vmax.f32 %v322_v10, %v313_v12  ;;  %v314_v17 = vmax.f32 %v283_v14, 0.0  ;;  %v285_v18 = vpop.f32.mrb[23].mxu0 }
 0x125   :  { %v324_v19 = vmax.f32 %v310_v15, %v314_v17 }
 0x127   :  { %v328_v20 = vpack.c.bf16 %v324_v19, %v323_v16 }
 0x129   :  { %583 = vmatpush3.bf16.msra.mxu1 %v328_v20 }
 0x12a   :  { %584 = vmatprep.subr.bf16.mxu1 %v665_v26 }
 0x12d   :  { %585 = vmatpush3.bf16.msra.mxu1 %v329_v52 }
 0x12e   :  { %586 = vmatprep.subr.bf16.mxu1 %v665_v26 }
 0x131   :  { %587 = vmatpush3.bf16.msra.mxu1 %v344_v23 }
 0x134   :  { %589 = vmatmul.mubr.msk.bf16.vlgmr.msra.gmra.mrb[8].mxu1 %vm338_vm3, %v660_v24 }
 0x135   :  { %594 = vmatprep.mubr.msk.bf16.mxu1 %vm181_vm0, %v661_v25 }
 0x207   :  { %v380_v27 = vpop.f32.mrb[8].mxu1 }
 0x208   :  { %v590_v28 = vpop.f32.mrb[9].mxu1  ;;  %v387_v30 = vmax.f32 %v380_v27, 0.0 }
 0x209   :  { %v383_v29 = vpop.f32.mrb[10].mxu1 }
 0x20a   :  { %v388_v31 = vmax.f32 %v383_v29, 0.0  ;;  %v591_v32 = vpop.f32.mrb[11].mxu1 }
 0x20c   :  { %v393_v33 = vpack.c.bf16 %v388_v31, %v387_v30 }
 0x20e   :  { %592 = vmatprep.subr.bf16.mxu1 %v393_v33 }
 0x20f   :  { %593 = vmatpush3.bf16.msra.mxu1 %v393_v33 }
 0x210   :  { %598 = vmatprep.subr.bf16.mxu1 %v665_v26 }
 0x212   :  { %595 = vmatmul.mubr.msk.bf16.vlgmr.msra.gmra.mrb[12].mxu1 %vm181_vm0, %v662_v34 }
 0x213   :  { %602 = vmatprep.mubr.msk.bf16.mxu1 %vm666_vm1, %v665_v26 }
 0x2e5   :  { %v596_v35 = vpop.f32.mrb[12].mxu1 }
 0x2e6   :  { %v444_v36 = vpop.f32.mrb[13].mxu1  ;;  %v461_v38 = vmax.f32 %v596_v35, 0.0 }
 0x2e7   :  { %v597_v37 = vpop.f32.mrb[14].mxu1  ;;  %v459_v41 = vmax.f32 %v444_v36, 0.0 }
 0x2e8   :  { %v462_v39 = vmax.f32 %v597_v37, 0.0  ;;  %v447_v40 = vpop.f32.mrb[15].mxu1 }
 0x2e9   :  { %v460_v42 = vmax.f32 %v447_v40, 0.0 }
 0x2ea   :  { %v466_v43 = vpack.c.bf16 %v462_v39, %v461_v38 }
 0x2eb   :  { %v465_v44 = vpack.c.bf16 %v460_v42, %v459_v41 }
 0x2ed   :  { %599 = vmatpush3.bf16.msra.mxu1 %v465_v44 }
 0x2ee   :  { %600 = vmatprep.subr.bf16.mxu1 %v665_v26 }
 0x2f1   :  { %601 = vmatpush3.bf16.msra.mxu1 %v466_v43 }
 0x2f4   :  { %603 = vmatmul.mubr.msk.bf16.vlgmr.msra.gmra.mrb[16].mxu1 %vm472_vm4, %v663_v45 }
 0x3c7   :  { %v510_v46 = vpop.f32.mrb[16].mxu1 }
 0x3c8   :  { %518 = vst.msk [vmem:[%s816_s5] sm:$0xff] %vm517_vm5, %v510_v46  ;;  %v604_v47 = vpop.f32.mrb[17].mxu1 }
 0x3c9   :  { %v513_v48 = vpop.f32.mrb[18].mxu1 }
 0x3ca   :  { %520 = vst.msk [vmem:[%s816_s5 + $0x8] sm:$0x3] %vm519_vm6, %v513_v48  ;;  %v605_v26 = vpop.f32.mrb[19].mxu1 }

</bundles_post_ra>
